<compile_context>
chip_gen: v5e
topology: v5e:2x2
jax: 0.10.0
libtpu: 0.0.40
codegen_flags: <defaults>
</compile_context>

<pallas_src>
import functools

import jax
import jax.numpy as jnp
from jax.experimental import pallas as pl
from jax.experimental.pallas import tpu as pltpu


def _round_up(x: int, m: int) -> int:
    return (x + m - 1) // m * m


def _make_encoder_kernel(num_hidden_layers: int, mu_cols: int):
    """Kernel for a fixed number of hidden (Linear+ReLU) layers.

    mu_cols: number of leading columns of the fused head output that belong to
    the mu head; the remaining columns get exp() applied (log_std -> std).
    """

    def kernel(*refs):
        # refs layout: x, (W_i, b_i) per hidden layer, W_head, b_head, out
        x_ref = refs[0]
        compute_dtype = x_ref.dtype
        idx = 1
        h = x_ref[...]
        for _ in range(num_hidden_layers):
            w_ref, b_ref = refs[idx], refs[idx + 1]
            idx += 2
            acc = jnp.dot(h, w_ref[...], preferred_element_type=jnp.float32)
            acc = acc + b_ref[...]                 # [1, D] f32 bias broadcasts
            h = jnp.maximum(acc, 0.0).astype(compute_dtype)

        w_head_ref, b_head_ref = refs[idx], refs[idx + 1]
        out_ref = refs[idx + 2]

        head = jnp.dot(h, w_head_ref[...], preferred_element_type=jnp.float32)
        head = head + b_head_ref[...]
        # Columns [0, mu_cols) are mu; the rest are log_std -> exp. exp uses
        # the EUP slot (free next to the MXU/VALU work); where() selects per
        # lane. Padded tail columns are discarded by the wrapper.
        col = jax.lax.broadcasted_iota(jnp.int32, head.shape, 1)
        out = jnp.where(col < mu_cols, head, jnp.exp(head))
        out_ref[...] = out.astype(out_ref.dtype)

    return kernel


def variational_encoder_forward(x, hidden_params, mu_params, log_std_params,
                                *, batch_tile=None, lane_multiple=128):
    """
    x:              [B, D_in]
    hidden_params:  list of (W [Din_i, Dout_i], b [Dout_i])  (weights [in, out])
    mu_params:      (W_mu [D_h, E], b_mu [E])
    log_std_params: (W_ls [D_h, E], b_ls [E])
    Returns (mu [B, E], std [B, E]).
    """
    B, D_in = x.shape
    E = mu_params[0].shape[1]
    num_hidden = len(hidden_params)

    # ---- feature-dim padding (exact: zero rows/cols contribute nothing) ----
    dims = [D_in] + [w.shape[1] for (w, _) in hidden_params]
    dims_pad = [_round_up(d, lane_multiple) for d in dims]
    two_e = 2 * E
    two_e_pad = _round_up(two_e, lane_multiple)

    x_p = x
    if dims_pad[0] != D_in:
        x_p = jnp.pad(x, ((0, 0), (0, dims_pad[0] - D_in)))

    padded_hidden = []
    for li, (w, b) in enumerate(hidden_params):
        din, dout = w.shape
        w_p = jnp.pad(w, ((0, dims_pad[li] - din), (0, dims_pad[li + 1] - dout)))
        b_p = jnp.pad(b.astype(jnp.float32),
                      (0, dims_pad[li + 1] - dout)).reshape(1, -1)
        padded_hidden.append((w_p, b_p))

    # ---- fused mu / log_std head: a single [D_h, 2E] matmul ----
    w_head = jnp.concatenate([mu_params[0], log_std_params[0]], axis=1)
    b_head = jnp.concatenate([mu_params[1], log_std_params[1]], axis=0)
    d_h = w_head.shape[0]
    w_head = jnp.pad(w_head, ((0, dims_pad[-1] - d_h), (0, two_e_pad - two_e)))
    b_head = jnp.pad(b_head.astype(jnp.float32),
                     (0, two_e_pad - two_e)).reshape(1, -1)

    # ---- batch tiling ----
    if batch_tile is None:
        # Tiny B: single grid step (per-step overhead ~0.35us would dominate).
        # Large B: 512-row tiles -> DMA/compute pipelining + multi-step grid
        # that "parallel" semantics can shard across TensorCores (v7x).
        batch_tile = min(_round_up(B, 8), 512)
    assert batch_tile % 8 == 0, "batch_tile must be a multiple of 8 (f32 sublane)"
    b_pad = _round_up(B, batch_tile)
    if b_pad != B:
        x_p = jnp.pad(x_p, ((0, b_pad - B), (0, 0)))
    grid = (b_pad // batch_tile,)

    # ---- flatten inputs + BlockSpecs ----
    flat_inputs = [x_p]
    in_specs = [pl.BlockSpec((batch_tile, dims_pad[0]), lambda i: (i, 0))]

    def add_param(w, b):
        # Constant index_map -> fetched once, resident in VMEM across steps.
        flat_inputs.append(w)
        in_specs.append(pl.BlockSpec(w.shape, lambda i: (0, 0)))
        flat_inputs.append(b)
        in_specs.append(pl.BlockSpec(b.shape, lambda i: (0, 0)))

    for w, b in padded_hidden:
        add_param(w, b)
    add_param(w_head, b_head)

    out_shape = jax.ShapeDtypeStruct((b_pad, two_e_pad), x.dtype)
    out_specs = pl.BlockSpec((batch_tile, two_e_pad), lambda i: (i, 0))

    # ---- VMEM budget (double-buffered tiles + f32 activation headroom) ----
    itemsize = x_p.dtype.itemsize
    est = 2 * batch_tile * dims_pad[0] * itemsize          # x tile
    est += 2 * batch_tile * two_e_pad * itemsize           # out tile
    for arr in flat_inputs[1:]:
        est += 2 * arr.size * arr.dtype.itemsize           # weights / biases
    est += 4 * batch_tile * max(dims_pad + [two_e_pad]) * 4  # f32 activations
    vmem_limit_bytes = None
    if est > 16 * 1024 * 1024:
        vmem_limit_bytes = min(int(est * 1.25), 64 * 1024 * 1024)

    kernel = _make_encoder_kernel(num_hidden, E)

    out = pl.pallas_call(
        kernel,
        out_shape=out_shape,
        grid_spec=pltpu.PrefetchScalarGridSpec(
            num_scalar_prefetch=0,
            grid=grid,
            in_specs=in_specs,
            out_specs=out_specs,
        ),
        compiler_params=pltpu.CompilerParams(
            dimension_semantics=("parallel",),
            vmem_limit_bytes=vmem_limit_bytes),
    )(*flat_inputs)

    out = out[:B]
    mu = out[:, :E]
    std = out[:, E:two_e]
    return mu, std


def init_params(key, input_size, hidden_sizes, emb_size, dtype=jnp.float32):
    """Deterministic PyTorch-Linear-style init; weights stored [in, out]."""
    layers_dim = [input_size] + list(hidden_sizes) + [emb_size]

    def linear_init(k, fan_in, fan_out):
        kw, kb = jax.random.split(k)
        bound = 1.0 / jnp.sqrt(fan_in)
        w = jax.random.uniform(kw, (fan_in, fan_out), dtype, -bound, bound)
        b = jax.random.uniform(kb, (fan_out,), dtype, -bound, bound)
        return w, b

    keys = jax.random.split(key, len(layers_dim))
    hidden_params = []
    for i in range(len(layers_dim) - 2):
        hidden_params.append(linear_init(keys[i], layers_dim[i], layers_dim[i + 1]))
    mu_params = linear_init(keys[-2], layers_dim[-2], layers_dim[-1])
    log_std_params = linear_init(keys[-1], layers_dim[-2], layers_dim[-1])
    return hidden_params, mu_params, log_std_params


def reference_forward(x, hidden_params, mu_params, log_std_params):
    h = x
    for w, b in hidden_params:
        h = jnp.maximum(h @ w + b, 0.0)
    mu = h @ mu_params[0] + mu_params[1]
    std = jnp.exp(h @ log_std_params[0] + log_std_params[1])
    return mu, std


if __name__ == "__main__":
    # Small shapes consistent with the module: input_size=32, hidden=(64, 48),
    # emb_size=16.
    input_size, hidden_sizes, emb_size = 32, (64, 48), 16

    key = jax.random.PRNGKey(0)
    k_x, k_x2, k_p = jax.random.split(key, 3)
    hidden_params, mu_params, log_std_params = init_params(
        k_p, input_size, hidden_sizes, emb_size)

    # jit the whole wrapper so the padding / head-fusion ops fuse into one
    # launch around the pallas_call.
    fwd = jax.jit(variational_encoder_forward)

    # --- case 1: tiny batch, single grid step ---
    B1 = 8
    x1 = jax.random.normal(k_x, (B1, input_size), jnp.float32)
    mu1, std1 = fwd(x1, hidden_params, mu_params, log_std_params)
    jax.block_until_ready((mu1, std1))
    mu1_ref, std1_ref = reference_forward(x1, hidden_params, mu_params,
                                          log_std_params)
    assert mu1.shape == (B1, emb_size) and std1.shape == (B1, emb_size)
    assert jnp.allclose(mu1, mu1_ref, atol=1e-5, rtol=1e-5)
    assert jnp.allclose(std1, std1_ref, atol=1e-5, rtol=1e-5)

    # --- case 2: non-multiple batch with forced tiling (multi-step grid) ---
    B2 = 300
    x2 = jax.random.normal(k_x2, (B2, input_size), jnp.float32)
    fwd_tiled = jax.jit(functools.partial(variational_encoder_forward,
                                          batch_tile=128))
    mu2, std2 = fwd_tiled(x2, hidden_params, mu_params, log_std_params)
    jax.block_until_ready((mu2, std2))
    mu2_ref, std2_ref = reference_forward(x2, hidden_params, mu_params,
                                          log_std_params)
    assert mu2.shape == (B2, emb_size) and std2.shape == (B2, emb_size)
    assert jnp.allclose(mu2, mu2_ref, atol=1e-5, rtol=1e-5)
    assert jnp.allclose(std2, std2_ref, atol=1e-5, rtol=1e-5)

    print("KERNEL_OK")
</pallas_src>

<mosaic_0001>
module attributes {stable_mosaic.version = 11 : i64} {
  func.func @kernel(%arg0: i32, %arg1: memref<8x128xf32, #tpu.memory_space<vmem>>, %arg2: memref<128x128xf32, #tpu.memory_space<vmem>>, %arg3: memref<1x128xf32, #tpu.memory_space<vmem>>, %arg4: memref<128x128xf32, #tpu.memory_space<vmem>>, %arg5: memref<1x128xf32, #tpu.memory_space<vmem>>, %arg6: memref<128x128xf32, #tpu.memory_space<vmem>>, %arg7: memref<1x128xf32, #tpu.memory_space<vmem>>, %arg8: memref<8x128xf32, #tpu.memory_space<vmem>>) attributes {dimension_semantics = [#tpu.dimension_semantics<parallel>], iteration_bounds = array<i64: 1>, scalar_prefetch = 0 : i64, scratch_operands = 0 : i64, tpu.core_type = #tpu.core_type<tc>, window_params = [{transform_indices = @transform_0, window_bounds = array<i64: 8, 128>}, {pipeline_mode = #tpu.pipeline_mode<synchronous>, transform_indices = @transform_1, window_bounds = array<i64: 128, 128>}, {pipeline_mode = #tpu.pipeline_mode<synchronous>, transform_indices = @transform_2, window_bounds = array<i64: 1, 128>}, {pipeline_mode = #tpu.pipeline_mode<synchronous>, transform_indices = @transform_3, window_bounds = array<i64: 128, 128>}, {pipeline_mode = #tpu.pipeline_mode<synchronous>, transform_indices = @transform_4, window_bounds = array<i64: 1, 128>}, {pipeline_mode = #tpu.pipeline_mode<synchronous>, transform_indices = @transform_5, window_bounds = array<i64: 128, 128>}, {pipeline_mode = #tpu.pipeline_mode<synchronous>, transform_indices = @transform_6, window_bounds = array<i64: 1, 128>}, {transform_indices = @transform_7, window_bounds = array<i64: 8, 128>}]} {
    %c0 = arith.constant 0 : index
    %c0_0 = arith.constant 0 : index
    %0 = vector.load %arg1[%c0, %c0_0] : memref<8x128xf32, #tpu.memory_space<vmem>>, vector<8x128xf32>
    %c0_1 = arith.constant 0 : index
    %c0_2 = arith.constant 0 : index
    %1 = vector.load %arg2[%c0_1, %c0_2] : memref<128x128xf32, #tpu.memory_space<vmem>>, vector<128x128xf32>
    %cst = arith.constant dense<0.000000e+00> : vector<8x128xf32>
    %2 = tpu.matmul %0, %1, %cst {dimension_numbers = #tpu.dot_dimension_numbers<[1], [0], [0], [1], [0, 0, 1, 1], [], []>} : vector<8x128xf32>, vector<128x128xf32>, vector<8x128xf32> -> vector<8x128xf32>
    %c0_3 = arith.constant 0 : index
    %c0_4 = arith.constant 0 : index
    %3 = vector.load %arg3[%c0_3, %c0_4] : memref<1x128xf32, #tpu.memory_space<vmem>>, vector<1x128xf32>
    %4 = vector.broadcast %3 : vector<1x128xf32> to vector<8x128xf32>
    %5 = arith.addf %2, %4 : vector<8x128xf32>
    %cst_5 = arith.constant 0.000000e+00 : f32
    %6 = vector.broadcast %cst_5 : f32 to vector<8x128xf32>
    %7 = arith.maximumf %5, %6 : vector<8x128xf32>
    %c0_6 = arith.constant 0 : index
    %c0_7 = arith.constant 0 : index
    %8 = vector.load %arg4[%c0_6, %c0_7] : memref<128x128xf32, #tpu.memory_space<vmem>>, vector<128x128xf32>
    %cst_8 = arith.constant dense<0.000000e+00> : vector<8x128xf32>
    %9 = tpu.matmul %7, %8, %cst_8 {dimension_numbers = #tpu.dot_dimension_numbers<[1], [0], [0], [1], [0, 0, 1, 1], [], []>} : vector<8x128xf32>, vector<128x128xf32>, vector<8x128xf32> -> vector<8x128xf32>
    %c0_9 = arith.constant 0 : index
    %c0_10 = arith.constant 0 : index
    %10 = vector.load %arg5[%c0_9, %c0_10] : memref<1x128xf32, #tpu.memory_space<vmem>>, vector<1x128xf32>
    %11 = vector.broadcast %10 : vector<1x128xf32> to vector<8x128xf32>
    %12 = arith.addf %9, %11 : vector<8x128xf32>
    %cst_11 = arith.constant 0.000000e+00 : f32
    %13 = vector.broadcast %cst_11 : f32 to vector<8x128xf32>
    %14 = arith.maximumf %12, %13 : vector<8x128xf32>
    %c0_12 = arith.constant 0 : index
    %c0_13 = arith.constant 0 : index
    %15 = vector.load %arg6[%c0_12, %c0_13] : memref<128x128xf32, #tpu.memory_space<vmem>>, vector<128x128xf32>
    %cst_14 = arith.constant dense<0.000000e+00> : vector<8x128xf32>
    %16 = tpu.matmul %14, %15, %cst_14 {dimension_numbers = #tpu.dot_dimension_numbers<[1], [0], [0], [1], [0, 0, 1, 1], [], []>} : vector<8x128xf32>, vector<128x128xf32>, vector<8x128xf32> -> vector<8x128xf32>
    %c0_15 = arith.constant 0 : index
    %c0_16 = arith.constant 0 : index
    %17 = vector.load %arg7[%c0_15, %c0_16] : memref<1x128xf32, #tpu.memory_space<vmem>>, vector<1x128xf32>
    %18 = vector.broadcast %17 : vector<1x128xf32> to vector<8x128xf32>
    %19 = arith.addf %16, %18 : vector<8x128xf32>
    %20 = tpu.iota {dimensions = array<i32: 1>} : vector<8x128xi32>
    %c16_i32 = arith.constant 16 : i32
    %21 = vector.broadcast %c16_i32 : i32 to vector<8x128xi32>
    %22 = arith.cmpi slt, %20, %21 : vector<8x128xi32>
    %23 = math.exp %19 : vector<8x128xf32>
    %24 = arith.select %22, %19, %23 : vector<8x128xi1>, vector<8x128xf32>
    %c0_17 = arith.constant 0 : index
    %c0_18 = arith.constant 0 : index
    %25 = vector.load %arg8[%c0_17, %c0_18] : memref<8x128xf32, #tpu.memory_space<vmem>>, vector<8x128xf32>
    tpu.vector_store %arg8[%c0_17, %c0_18], %24 {strides = array<i32>} : memref<8x128xf32, #tpu.memory_space<vmem>>, vector<8x128xf32>,
    return
  }
  func.func @transform_0(%arg0: i32) -> (i32, i32) {
    %c0_i32 = arith.constant 0 : i32
    %c0_i32_0 = arith.constant 0 : i32
    return %arg0, %c0_i32 : i32, i32
  }
  func.func @transform_1(%arg0: i32) -> (i32, i32) {
    %c0_i32 = arith.constant 0 : i32
    %c0_i32_0 = arith.constant 0 : i32
    %c0_i32_1 = arith.constant 0 : i32
    return %c0_i32, %c0_i32_0 : i32, i32
  }
  func.func @transform_2(%arg0: i32) -> (i32, i32) {
    %c0_i32 = arith.constant 0 : i32
    %c0_i32_0 = arith.constant 0 : i32
    %c0_i32_1 = arith.constant 0 : i32
    return %c0_i32, %c0_i32_0 : i32, i32
  }
  func.func @transform_3(%arg0: i32) -> (i32, i32) {
    %c0_i32 = arith.constant 0 : i32
    %c0_i32_0 = arith.constant 0 : i32
    %c0_i32_1 = arith.constant 0 : i32
    return %c0_i32, %c0_i32_0 : i32, i32
  }
  func.func @transform_4(%arg0: i32) -> (i32, i32) {
    %c0_i32 = arith.constant 0 : i32
    %c0_i32_0 = arith.constant 0 : i32
    %c0_i32_1 = arith.constant 0 : i32
    return %c0_i32, %c0_i32_0 : i32, i32
  }
  func.func @transform_5(%arg0: i32) -> (i32, i32) {
    %c0_i32 = arith.constant 0 : i32
    %c0_i32_0 = arith.constant 0 : i32
    %c0_i32_1 = arith.constant 0 : i32
    return %c0_i32, %c0_i32_0 : i32, i32
  }
  func.func @transform_6(%arg0: i32) -> (i32, i32) {
    %c0_i32 = arith.constant 0 : i32
    %c0_i32_0 = arith.constant 0 : i32
    %c0_i32_1 = arith.constant 0 : i32
    return %c0_i32, %c0_i32_0 : i32, i32
  }
  func.func @transform_7(%arg0: i32) -> (i32, i32) {
    %c0_i32 = arith.constant 0 : i32
    %c0_i32_0 = arith.constant 0 : i32
    return %arg0, %c0_i32 : i32, i32
  }
}

</mosaic_0001>

<bundles_post_ra>
// kernel: variational_encoder_forward.1
= control target key start
LH: loop header
LB: loop body
LE: loop exit
PB: predicated region body
PF: predicated region fallthrough
CT: control target
= control target key end

     0   :  { %v149_v60 = vlaneseq  ;;  %s364_s1 = inlined_call_operand.vmem [shape: f32[128,128], index: 1, kind: input, shape index: {}]   ;;  %s365_s3 = inlined_call_operand.vmem [shape: f32[128,128], index: 3, kind: input, shape index: {}]   ;;  %s366_s2 = inlined_call_operand.vmem [shape: f32[1,128], index: 2, kind: input, shape index: {}]   ;;  %s367_s0 = inlined_call_operand.vmem [shape: f32[8,128], index: 0, kind: input, shape index: {}]   ;;  %s368_s4 = inlined_call_operand.vmem [shape: f32[1,128], index: 4, kind: input, shape index: {}]   ;;  %s369_s5 = inlined_call_operand.vmem [shape: f32[128,128], index: 5, kind: input, shape index: {}]   ;;  %s370_s6 = inlined_call_operand.vmem [shape: f32[1,128], index: 6, kind: input, shape index: {}]   ;;  %s371_s7 = inlined_call_operand.vmem [shape: f32[8,128], index: 7, kind: output, shape index: {}]  }
   0x1   :  { %v42_v0 = vld [vmem:[%s364_s1 + $0x78] sm:$0xff]  ;;  %v41_v1 = vld [vmem:[%s364_s1 + $0x70] sm:$0xff]  ;;  %v40_v2 = vld [vmem:[%s364_s1 + $0x68] sm:$0xff] }
   0x2   :  { %47 = vmatpush.msra.mxu0 %v42_v0  ;;  %v39_v3 = vld [vmem:[%s364_s1 + $0x60] sm:$0xff]  ;;  %v83_v4 = vld [vmem:[%s365_s3 + $0x78] sm:$0xff]  ;;  %v82_v6 = vld [vmem:[%s365_s3 + $0x70] sm:$0xff]  ;;  %v150_v62 = vand.u32 127, %v149_v60 }
   0x3   :  { %v38_v5 = vld [vmem:[%s364_s1 + $0x58] sm:$0xff]  ;;  %88 = vmatpush.msra.mxu1 %v83_v4  ;;  %v81_v7 = vld [vmem:[%s365_s3 + $0x68] sm:$0xff]  ;;  %v37_v8 = vld [vmem:[%s364_s1 + $0x50] sm:$0xff] }
   0x4   :  { %48 = vmatpush.msra.mxu0 %v41_v1  ;;  %v80_v9 = vld [vmem:[%s365_s3 + $0x60] sm:$0xff]  ;;  %v36_v10 = vld [vmem:[%s364_s1 + $0x48] sm:$0xff]  ;;  %v79_v11 = vld [vmem:[%s365_s3 + $0x58] sm:$0xff]  ;;  %vm151_vm0 = vcmp.lt.s32.totalorder %v150_v62, 16 }
   0x5   :  { %89 = vmatpush.msra.mxu1 %v82_v6  ;;  %v35_v12 = vld [vmem:[%s364_s1 + $0x40] sm:$0xff]  ;;  %v78_v13 = vld [vmem:[%s365_s3 + $0x50] sm:$0xff]  ;;  %v34_v14 = vld [vmem:[%s364_s1 + $0x38] sm:$0xff] }
   0x6   :  { %49 = vmatpush.msra.mxu0 %v40_v2  ;;  %v77_v15 = vld [vmem:[%s365_s3 + $0x48] sm:$0xff]  ;;  %v33_v16 = vld [vmem:[%s364_s1 + $0x30] sm:$0xff]  ;;  %v76_v17 = vld [vmem:[%s365_s3 + $0x40] sm:$0xff] }
   0x7   :  { %90 = vmatpush.msra.mxu1 %v81_v7  ;;  %v32_v18 = vld [vmem:[%s364_s1 + $0x28] sm:$0xff]  ;;  %v75_v19 = vld [vmem:[%s365_s3 + $0x38] sm:$0xff]  ;;  %v31_v20 = vld [vmem:[%s364_s1 + $0x20] sm:$0xff] }
   0x8   :  { %50 = vmatpush.msra.mxu0 %v39_v3  ;;  %v74_v21 = vld [vmem:[%s365_s3 + $0x30] sm:$0xff]  ;;  %v30_v22 = vld [vmem:[%s364_s1 + $0x18] sm:$0xff]  ;;  %v73_v23 = vld [vmem:[%s365_s3 + $0x28] sm:$0xff] }
   0x9   :  { %91 = vmatpush.msra.mxu1 %v80_v9  ;;  %v29_v24 = vld [vmem:[%s364_s1 + $0x10] sm:$0xff]  ;;  %v72_v25 = vld [vmem:[%s365_s3 + $0x20] sm:$0xff]  ;;  %v28_v26 = vld [vmem:[%s364_s1 + $0x8] sm:$0xff] }
   0xa   :  { %51 = vmatpush.msra.mxu0 %v38_v5  ;;  %v71_v27 = vld [vmem:[%s365_s3 + $0x18] sm:$0xff]  ;;  %v27_v28 = vld [vmem:[%s364_s1] sm:$0xff]  ;;  %v70_v30 = vld [vmem:[%s365_s3 + $0x10] sm:$0xff] }
   0xb   :  { %92 = vmatpush.msra.mxu1 %v79_v11  ;;  %v26_v29 = vld [vmem:[%s367_s0] sm:$0xff]  ;;  %v69_v31 = vld [vmem:[%s365_s3 + $0x8] sm:$0xff]  ;;  %v124_v33 = vld [vmem:[%s369_s5 + $0x78] sm:$0xff] }
   0xc   :  { %52 = vmatpush.msra.mxu0 %v37_v8  ;;  %v68_v32 = vld [vmem:[%s365_s3] sm:$0xff]  ;;  %v123_v34 = vld [vmem:[%s369_s5 + $0x70] sm:$0xff]  ;;  %129 = vmatpush.msra.mxu2 %v124_v33  ;;  %v122_v35 = vld [vmem:[%s369_s5 + $0x68] sm:$0xff] }
   0xd   :  { %93 = vmatpush.msra.mxu1 %v78_v13  ;;  %v121_v36 = vld [vmem:[%s369_s5 + $0x60] sm:$0xff]  ;;  %v120_v37 = vld [vmem:[%s369_s5 + $0x58] sm:$0xff]  ;;  %v119_v38 = vld [vmem:[%s369_s5 + $0x50] sm:$0xff] }
   0xe   :  { %53 = vmatpush.msra.mxu0 %v36_v10  ;;  %130 = vmatpush.msra.mxu2 %v123_v34  ;;  %v118_v39 = vld [vmem:[%s369_s5 + $0x48] sm:$0xff]  ;;  %v117_v40 = vld [vmem:[%s369_s5 + $0x40] sm:$0xff]  ;;  %v116_v41 = vld [vmem:[%s369_s5 + $0x38] sm:$0xff] }
   0xf   :  { %94 = vmatpush.msra.mxu1 %v77_v15  ;;  %v115_v42 = vld [vmem:[%s369_s5 + $0x30] sm:$0xff]  ;;  %v114_v43 = vld [vmem:[%s369_s5 + $0x28] sm:$0xff]  ;;  %v113_v44 = vld [vmem:[%s369_s5 + $0x20] sm:$0xff] }
  0x10   :  { %54 = vmatpush.msra.mxu0 %v35_v12  ;;  %131 = vmatpush.msra.mxu2 %v122_v35  ;;  %v112_v45 = vld [vmem:[%s369_s5 + $0x18] sm:$0xff]  ;;  %v160_v46 = vld [vmem:[%s366_s2] ss:$0 sm:$0xff]  ;;  %v111_v50 = vld [vmem:[%s369_s5 + $0x10] sm:$0xff] }
  0x11   :  { %95 = vmatpush.msra.mxu1 %v76_v17  ;;  %v110_v51 = vld [vmem:[%s369_s5 + $0x8] sm:$0xff]  ;;  %v109_v52 = vld [vmem:[%s369_s5] sm:$0xff] }
  0x12   :  { %55 = vmatpush.msra.mxu0 %v34_v14  ;;  %132 = vmatpush.msra.mxu2 %v121_v36  ;;  %v161_v53 = vld [vmem:[%s368_s4] ss:$0 sm:$0xff] }
  0x13   :  { %96 = vmatpush.msra.mxu1 %v75_v19  ;;  %v162_v57 = vld [vmem:[%s370_s6] ss:$0 sm:$0xff] }
  0x14   :  { %56 = vmatpush.msra.mxu0 %v33_v16  ;;  %133 = vmatpush.msra.mxu2 %v120_v37 }
  0x15   :  { %97 = vmatpush.msra.mxu1 %v74_v21 }
  0x16   :  { %57 = vmatpush.msra.mxu0 %v32_v18  ;;  %134 = vmatpush.msra.mxu2 %v119_v38 }
  0x17   :  { %98 = vmatpush.msra.mxu1 %v73_v23 }
  0x18   :  { %58 = vmatpush.msra.mxu0 %v31_v20  ;;  %135 = vmatpush.msra.mxu2 %v118_v39 }
  0x19   :  { %99 = vmatpush.msra.mxu1 %v72_v25 }
  0x1a   :  { %59 = vmatpush.msra.mxu0 %v30_v22  ;;  %136 = vmatpush.msra.mxu2 %v117_v40 }
  0x1b   :  { %100 = vmatpush.msra.mxu1 %v71_v27 }
  0x1c   :  { %60 = vmatpush.msra.mxu0 %v29_v24  ;;  %137 = vmatpush.msra.mxu2 %v116_v41 }
  0x1d   :  { %101 = vmatpush.msra.mxu1 %v70_v30 }
  0x1e   :  { %61 = vmatpush.msra.mxu0 %v28_v26  ;;  %138 = vmatpush.msra.mxu2 %v115_v42 }
  0x1f   :  { %102 = vmatpush.msra.mxu1 %v69_v31 }
  0x20   :  { %62 = vmatpush.msra.mxu0 %v27_v28  ;;  %139 = vmatpush.msra.mxu2 %v114_v43 }
  0x21   :  { %63 = vmatmul.f32.vlgmr.msra.gmra.mxu0 %v26_v29  ;;  %103 = vmatpush.msra.mxu1 %v68_v32 }
  0x22   :  { %140 = vmatpush.msra.mxu2 %v113_v44 }
  0x24   :  { %141 = vmatpush.msra.mxu2 %v112_v45 }
  0x26   :  { %142 = vmatpush.msra.mxu2 %v111_v50 }
  0x28   :  { %143 = vmatpush.msra.mxu2 %v110_v51 }
  0x2a   :  { %144 = vmatpush.msra.mxu2 %v109_v52 }
  0x9e   :  { %v64_v47 = vpop.f32.mrf.mxu0 }
  0x9f   :  { %v65_v48 = vadd.f32 %v160_v46, %v64_v47 }
  0xa1   :  { %v67_v49 = vmax.f32 %v65_v48, 0.0 }
  0xa3   :  { %104 = vmatmul.f32.vlgmr.msra.gmra.mxu1 %v67_v49 }
 0x120   :  { %v105_v54 = vpop.f32.mrf.mxu1 }
 0x121   :  { %v106_v55 = vadd.f32 %v161_v53, %v105_v54 }
 0x123   :  { %v108_v56 = vmax.f32 %v106_v55, 0.0 }
 0x125   :  { %145 = vmatmul.f32.vlgmr.msra.gmra.mxu2 %v108_v56 }
 0x1a8   :  { %v146_v58 = vpop.f32.mrf.mxu2 }
 0x1a9   :  { %v147_v59 = vadd.f32 %v162_v57, %v146_v58 }
 0x1ab   :  { %v152_v61 = vmul.f32 1.442695, %v147_v59 }
 0x1ad   :  { %163 = vpow2.f32 %v152_v61 }
 0x1b3   :  { %v164_v63 = vpop.eup %163 }
 0x1b4   :  { %v154_v0 = vsel %vm151_vm0, %v147_v59, %v164_v63 }
 0x1b5   :  { %155 = vst [vmem:[%s371_s7] sm:$0xff] %v154_v0 }

</bundles_post_ra>
